<compile_context>
chip_gen: v5e
topology: v5e:2x2
jax: 0.10.0
libtpu: 0.0.40
codegen_flags: <defaults>
</compile_context>

<pallas_src>
import jax
import jax.numpy as jnp
from jax.experimental import pallas as pl
from jax.experimental.pallas import tpu as pltpu


def _round_up(x, m):
    return ((x + m - 1) // m) * m


def encoder_kernel(x_ref, wf_ref, bf_ref, o_ref):
    # x: (TM, Ip), wf: (Ip, Op) fused + pre-transposed weight, bf: (1, Op)
    out = jnp.dot(x_ref[...], wf_ref[...], preferred_element_type=jnp.float32)
    o_ref[...] = (out + bf_ref[...]).astype(o_ref.dtype)


def encoder_forward(x, hidden, params):
    """x: (S, B, input_size) float32; hidden is passed through unchanged."""
    w1, b1, w2, b2 = params["w1"], params["b1"], params["w2"], params["b2"]
    S, B, I = x.shape
    O = w2.shape[0]

    # ---- Fold the two Linears into a single affine map (done once, outside) ----
    #   (x @ W1^T + b1) @ W2^T + b2  ==  x @ (W2 @ W1)^T + (b1 @ W2^T + b2)
    wf_t = (w2 @ w1).T          # (I, O): already transposed for x @ wf_t
    bf = b1 @ w2.T + b2         # (O,)

    rows = S * B
    x2d = x.reshape(rows, I)

    # ---- Pad to lane-dense shapes: last dim -> mult of 128, rows -> mult of 8 ----
    LANE, SUB = 128, 8
    Ip = _round_up(I, LANE)
    Op = _round_up(O, LANE)
    rows_p = _round_up(rows, SUB)
    TM = rows_p if rows_p <= 512 else 512      # row tile; single tile at toy sizes
    rows_p = _round_up(rows_p, TM)

    x_p = jnp.zeros((rows_p, Ip), x.dtype).at[:rows, :I].set(x2d)
    wf_p = jnp.zeros((Ip, Op), wf_t.dtype).at[:I, :O].set(wf_t)
    bf_p = jnp.zeros((1, Op), bf.dtype).at[0, :O].set(bf)

    out_p = pl.pallas_call(
        encoder_kernel,
        out_shape=jax.ShapeDtypeStruct((rows_p, Op), x.dtype),
        grid=(rows_p // TM,),
        in_specs=[
            pl.BlockSpec((TM, Ip), lambda i: (i, 0)),   # activation stream (tiled)
            pl.BlockSpec((Ip, Op), lambda i: (0, 0)),   # fused weight, VMEM-resident
            pl.BlockSpec((1, Op), lambda i: (0, 0)),    # fused bias, VMEM-resident
        ],
        out_specs=pl.BlockSpec((TM, Op), lambda i: (i, 0)),
        compiler_params=pltpu.CompilerParams(
            dimension_semantics=("parallel",),
        ),
    )(x_p, wf_p, bf_p)

    out = out_p[:rows, :O].reshape(S, B, O)
    return out, hidden


def init_params(key, input_size, hidden_size, output_size):
    # Deterministic init mimicking nn.Linear default (uniform in +/- 1/sqrt(fan_in)).
    k1, k2, k3, k4 = jax.random.split(key, 4)
    bound1 = 1.0 / (input_size ** 0.5)
    bound2 = 1.0 / (hidden_size ** 0.5)
    w1 = jax.random.uniform(k1, (hidden_size, input_size), jnp.float32, -bound1, bound1)
    b1 = jax.random.uniform(k2, (hidden_size,), jnp.float32, -bound1, bound1)
    w2 = jax.random.uniform(k3, (output_size, hidden_size), jnp.float32, -bound2, bound2)
    b2 = jax.random.uniform(k4, (output_size,), jnp.float32, -bound2, bound2)
    # TODO(synk): GRU weights from __init__ are unused in forward(), so they are not created here.
    return {"w1": w1, "b1": b1, "w2": w2, "b2": b2}


if __name__ == "__main__":
    input_size, hidden_size, output_size = 16, 32, 16
    seq, batch = 8, 2

    key = jax.random.PRNGKey(0)
    kx, kh, kp = jax.random.split(key, 3)

    x = jax.random.normal(kx, (seq, batch, input_size), jnp.float32)
    hidden = jax.random.uniform(kh, (1, 1, hidden_size), jnp.float32)  # init_hidden()
    params = init_params(kp, input_size, hidden_size, output_size)

    out, hid = encoder_forward(x, hidden, params)
    out = jax.block_until_ready(out)
    hid = jax.block_until_ready(hid)

    # Pure-JAX reference (original two-Linear formulation).
    ref = x.reshape(-1, input_size) @ params["w1"].T + params["b1"]
    ref = (ref @ params["w2"].T + params["b2"]).reshape(seq, batch, output_size)
    # Folded-weight rounding order differs slightly from the two-matmul reference.
    assert jnp.allclose(out, ref, atol=1e-4, rtol=1e-4), "mismatch vs reference"
    assert out.shape == (seq, batch, output_size)
    assert hid.shape == (1, 1, hidden_size)
    assert bool(jnp.all(hid == hidden)), "hidden must pass through unchanged"

    print("KERNEL_OK")
</pallas_src>

<mosaic_0001>
module attributes {stable_mosaic.version = 11 : i64} {
  func.func @encoder_kernel(%arg0: i32, %arg1: memref<16x128xf32, #tpu.memory_space<vmem>>, %arg2: memref<128x128xf32, #tpu.memory_space<vmem>>, %arg3: memref<1x128xf32, #tpu.memory_space<vmem>>, %arg4: memref<16x128xf32, #tpu.memory_space<vmem>>) attributes {dimension_semantics = [#tpu.dimension_semantics<parallel>], iteration_bounds = array<i64: 1>, scalar_prefetch = 0 : i64, scratch_operands = 0 : i64, tpu.core_type = #tpu.core_type<tc>, window_params = [{transform_indices = @transform_0, window_bounds = array<i64: 16, 128>}, {pipeline_mode = #tpu.pipeline_mode<synchronous>, transform_indices = @transform_1, window_bounds = array<i64: 128, 128>}, {pipeline_mode = #tpu.pipeline_mode<synchronous>, transform_indices = @transform_2, window_bounds = array<i64: 1, 128>}, {transform_indices = @transform_3, window_bounds = array<i64: 16, 128>}]} {
    %c0 = arith.constant 0 : index
    %c0_0 = arith.constant 0 : index
    %0 = vector.load %arg1[%c0, %c0_0] : memref<16x128xf32, #tpu.memory_space<vmem>>, vector<16x128xf32>
    %c0_1 = arith.constant 0 : index
    %c0_2 = arith.constant 0 : index
    %1 = vector.load %arg2[%c0_1, %c0_2] : memref<128x128xf32, #tpu.memory_space<vmem>>, vector<128x128xf32>
    %cst = arith.constant dense<0.000000e+00> : vector<16x128xf32>
    %2 = tpu.matmul %0, %1, %cst {dimension_numbers = #tpu.dot_dimension_numbers<[1], [0], [0], [1], [0, 0, 1, 1], [], []>} : vector<16x128xf32>, vector<128x128xf32>, vector<16x128xf32> -> vector<16x128xf32>
    %c0_3 = arith.constant 0 : index
    %c0_4 = arith.constant 0 : index
    %3 = vector.load %arg3[%c0_3, %c0_4] : memref<1x128xf32, #tpu.memory_space<vmem>>, vector<1x128xf32>
    %4 = vector.broadcast %3 : vector<1x128xf32> to vector<16x128xf32>
    %5 = arith.addf %2, %4 : vector<16x128xf32>
    %c0_5 = arith.constant 0 : index
    %c0_6 = arith.constant 0 : index
    %6 = vector.load %arg4[%c0_5, %c0_6] : memref<16x128xf32, #tpu.memory_space<vmem>>, vector<16x128xf32>
    tpu.vector_store %arg4[%c0_5, %c0_6], %5 {strides = array<i32>} : memref<16x128xf32, #tpu.memory_space<vmem>>, vector<16x128xf32>,
    return
  }
  func.func @transform_0(%arg0: i32) -> (i32, i32) {
    %c0_i32 = arith.constant 0 : i32
    %c0_i32_0 = arith.constant 0 : i32
    return %arg0, %c0_i32 : i32, i32
  }
  func.func @transform_1(%arg0: i32) -> (i32, i32) {
    %c0_i32 = arith.constant 0 : i32
    %c0_i32_0 = arith.constant 0 : i32
    %c0_i32_1 = arith.constant 0 : i32
    return %c0_i32, %c0_i32_0 : i32, i32
  }
  func.func @transform_2(%arg0: i32) -> (i32, i32) {
    %c0_i32 = arith.constant 0 : i32
    %c0_i32_0 = arith.constant 0 : i32
    %c0_i32_1 = arith.constant 0 : i32
    return %c0_i32, %c0_i32_0 : i32, i32
  }
  func.func @transform_3(%arg0: i32) -> (i32, i32) {
    %c0_i32 = arith.constant 0 : i32
    %c0_i32_0 = arith.constant 0 : i32
    return %arg0, %c0_i32 : i32, i32
  }
}

</mosaic_0001>

<bundles_post_ra>
// kernel: tpu_custom_call.1
= control target key start
LH: loop header
LB: loop body
LE: loop exit
PB: predicated region body
PF: predicated region fallthrough
CT: control target
= control target key end

     0   :  { %8 = vsyncpa [#allocation3], 0  ;;  %s260_s0 = inlined_call_operand.hbm [shape: f32[16,128], index: 0, kind: input, shape index: {}]   ;;  %s261_s1 = inlined_call_operand.hbm [shape: f32[128,128], index: 1, kind: input, shape index: {}]   ;;  %s262_s2 = inlined_call_operand.vmem [shape: f32[1,128], index: 2, kind: input, shape index: {}]   ;;  %s263_s3 = inlined_call_operand.hbm [shape: f32[16,128], index: 3, kind: output, shape index: {}]  }
   0x1   :  { %9 = vsyncpa [#allocation6], 0 }
   0x2   :  { %10 = vsyncpa [#allocation4], 0  ;;  %s15_s14 = sshll.u32 %s260_s0, 4  ;;  %s214_s15 = smov [#allocation2]   ;;  %s16_s14 = int_to_ptr.hbm [resolvable:$true] %s15_s14 }
   0x3   :  { %s17_s16 = sshll.u32 %s214_s15, 4  ;;  %s28_s19 = sshll.u32 %s261_s1, 4  ;;  %s18_s16 = int_to_ptr.vmem [resolvable:$true] %s17_s16  ;;  %s29_s19 = int_to_ptr.hbm [resolvable:$true] %s28_s19 }
   0x4   :  { %s215_s20 = smov 128   ;;  %s216_s21 = smov 8  }
   0x5   :  { %23 = dma.hbm_to_vmem [thread:$0]  %s16_s14, 256, %s18_s16, [#allocation3], %s215_s20, %s215_s20, %s216_s21  }
   0x6   :  { %s217_s22 = smov [#allocation5]  }
   0x7   :  { %s30_s23 = sshll.u32 %s217_s22, 4  ;;  %s31_s23 = int_to_ptr.vmem [resolvable:$true] %s30_s23 }
   0x8   :  { %36 = dma.hbm_to_vmem [thread:$0]  %s29_s19, 2048, %s31_s23, [#allocation6], %s215_s20, %s215_s20, %s216_s21  }
   0x9   :  { %208 = dma.done.wait [#allocation3], 256  }
   0xa   :  { %209 = vsyncadd [#allocation3], 4294967040 }
   0xb   :  { %210 = dma.done.wait [#allocation6], 2048  }
   0xc   :  { %211 = vsyncadd [#allocation6], 4294965248  ;;  %v64_v0 = vld [vmem:[#allocation5 + $0x78] sm:$0xff]  ;;  %v63_v1 = vld [vmem:[#allocation5 + $0x70] sm:$0xff]  ;;  %s218_s24 = smov [#allocation7]   ;;  %s100_s28 = sshll.u32 %s263_s3, 4  ;;  %s101_s28 = int_to_ptr.hbm [resolvable:$true] %s100_s28 }
   0xd   :  { %69 = vmatpush.msra.mxu0 %v64_v0  ;;  %114 = vmatpush.msra.mxu1 %v64_v0  ;;  %v62_v2 = vld [vmem:[#allocation5 + $0x68] sm:$0xff]  ;;  %v61_v3 = vld [vmem:[#allocation5 + $0x60] sm:$0xff]  ;;  %v60_v4 = vld [vmem:[#allocation5 + $0x58] sm:$0xff]  ;;  %s98_s25 = sshll.u32 %s218_s24, 4  ;;  %s99_s25 = int_to_ptr.vmem [resolvable:$true] %s98_s25 }
   0xe   :  { %v59_v5 = vld [vmem:[#allocation5 + $0x50] sm:$0xff]  ;;  %v58_v6 = vld [vmem:[#allocation5 + $0x48] sm:$0xff]  ;;  %v57_v7 = vld [vmem:[#allocation5 + $0x40] sm:$0xff] }
   0xf   :  { %70 = vmatpush.msra.mxu0 %v63_v1  ;;  %115 = vmatpush.msra.mxu1 %v63_v1  ;;  %v56_v8 = vld [vmem:[#allocation5 + $0x38] sm:$0xff]  ;;  %v55_v9 = vld [vmem:[#allocation5 + $0x30] sm:$0xff]  ;;  %v54_v10 = vld [vmem:[#allocation5 + $0x28] sm:$0xff] }
  0x10   :  { %v53_v11 = vld [vmem:[#allocation5 + $0x20] sm:$0xff]  ;;  %v52_v12 = vld [vmem:[#allocation5 + $0x18] sm:$0xff]  ;;  %v51_v13 = vld [vmem:[#allocation5 + $0x10] sm:$0xff] }
  0x11   :  { %71 = vmatpush.msra.mxu0 %v62_v2  ;;  %116 = vmatpush.msra.mxu1 %v62_v2  ;;  %v50_v14 = vld [vmem:[#allocation5 + $0x8] sm:$0xff]  ;;  %v49_v15 = vld [vmem:[#allocation5] sm:$0xff]  ;;  %v47_v16 = vld [vmem:[#allocation2] sm:$0xff] }
  0x12   :  { %v48_v17 = vld [vmem:[#allocation2 + $0x8] sm:$0xff]  ;;  %v135_v18 = vld [vmem:[%s262_s2] ss:$0 sm:$0xff] }
  0x13   :  { %72 = vmatpush.msra.mxu0 %v61_v3  ;;  %117 = vmatpush.msra.mxu1 %v61_v3 }
  0x15   :  { %73 = vmatpush.msra.mxu0 %v60_v4  ;;  %118 = vmatpush.msra.mxu1 %v60_v4 }
  0x17   :  { %74 = vmatpush.msra.mxu0 %v59_v5  ;;  %119 = vmatpush.msra.mxu1 %v59_v5 }
  0x19   :  { %75 = vmatpush.msra.mxu0 %v58_v6  ;;  %120 = vmatpush.msra.mxu1 %v58_v6 }
  0x1b   :  { %76 = vmatpush.msra.mxu0 %v57_v7  ;;  %121 = vmatpush.msra.mxu1 %v57_v7 }
  0x1d   :  { %77 = vmatpush.msra.mxu0 %v56_v8  ;;  %122 = vmatpush.msra.mxu1 %v56_v8 }
  0x1f   :  { %78 = vmatpush.msra.mxu0 %v55_v9  ;;  %123 = vmatpush.msra.mxu1 %v55_v9 }
  0x21   :  { %79 = vmatpush.msra.mxu0 %v54_v10  ;;  %124 = vmatpush.msra.mxu1 %v54_v10 }
  0x23   :  { %80 = vmatpush.msra.mxu0 %v53_v11  ;;  %125 = vmatpush.msra.mxu1 %v53_v11 }
  0x25   :  { %81 = vmatpush.msra.mxu0 %v52_v12  ;;  %126 = vmatpush.msra.mxu1 %v52_v12 }
  0x27   :  { %82 = vmatpush.msra.mxu0 %v51_v13  ;;  %127 = vmatpush.msra.mxu1 %v51_v13 }
  0x29   :  { %83 = vmatpush.msra.mxu0 %v50_v14  ;;  %128 = vmatpush.msra.mxu1 %v50_v14 }
  0x2b   :  { %84 = vmatpush.msra.mxu0 %v49_v15  ;;  %129 = vmatpush.msra.mxu1 %v49_v15 }
  0x2c   :  { %85 = vmatmul.f32.vlgmr.msra.gmra.mxu0 %v47_v16  ;;  %88 = vmatmul.f32.vlgmr.msra.gmra.mxu1 %v48_v17 }
  0xa9   :  { %v86_v19 = vpop.f32.mrf.mxu0  ;;  %v89_v20 = vpop.f32.mrf.mxu1 }
  0xaa   :  { %v87_v21 = vadd.f32 %v135_v18, %v86_v19  ;;  %v90_v22 = vadd.f32 %v135_v18, %v89_v20 }
  0xac   :  { %92 = vst [vmem:[#allocation7] sm:$0xff] %v87_v21 }
  0xad   :  { %93 = vst [vmem:[#allocation7 + $0x8] sm:$0xff] %v90_v22 }
  0xae   :  { %106 = dma.vmem_to_hbm [thread:$0]  %s99_s25, 256, %s101_s28, [#allocation4], %s215_s20, %s215_s20, %s216_s21  }
  0xaf   :  { %212 = dma.done.wait [#allocation4], 256  }
  0xb0   :  { %213 = vsyncadd [#allocation4], 4294967040 }
  0xb1   :  { %111 = vsyncpa [#allocation3], 1 }
  0xb2   :  { %112 = vsyncpa [#allocation6], 1 }
  0xb3   :  { %113 = vsyncpa [#allocation4], 1 }

</bundles_post_ra>
